<compile_context>
chip_gen: v6e
topology: v6e:2x2x1
jax: 0.10.0
libtpu: 0.0.40
codegen_flags: <defaults>
</compile_context>

<pallas_src>
import jax
import jax.numpy as jnp
import numpy as np
from jax import lax
from jax.experimental import pallas as pl
from jax.experimental.pallas import tpu as pltpu


def simple_rnn_kernel(x_ref,     # (S, E)  embedded sentence
                      wih_ref,   # (E, H)  = W_ih^T
                      whh_ref,   # (H, H)  = W_hh^T
                      b_ref,     # (1, H)  = b_ih + b_hh (pre-folded)
                      wt_ref,    # (H, T)  = W_tag^T
                      bt_ref,    # (1, T)
                      out_ref,   # (S, T)  log-softmax tag scores
                      h_scratch  # scratch (S, H): xproj, then hidden states
                      ):
    seq_len = x_ref.shape[0]
    hidden_dim = whh_ref.shape[0]

    # Hoisted input projection: single MXU-friendly (S,E)@(E,H) matmul + fused bias.
    h_scratch[...] = (
        jnp.dot(x_ref[...], wih_ref[...], preferred_element_type=jnp.float32)
        + b_ref[...]
    )

    # Loop-invariant recurrent weight: load once, keep resident in vregs.
    w_hh = whh_ref[...]

    def step(t, h):
        # h_t = tanh(xproj[t] + h_{t-1} @ W_hh^T)
        row = pl.ds(t, 1)
        h_new = jnp.tanh(
            h_scratch[row, :]
            + jnp.dot(h, w_hh, preferred_element_type=jnp.float32)
        )
        h_scratch[row, :] = h_new   # overwrite xproj row with the hidden state
        return h_new

    h0 = jnp.zeros((1, hidden_dim), dtype=jnp.float32)  # init_hidden() -> zeros
    # Fully unrolled recurrence: seq_len is static and small.
    lax.fori_loop(0, seq_len, step, h0, unroll=True)

    # hidden2tag: (S, H) @ (H, T) + b, then log_softmax over the tag axis (dim=1).
    tag_space = (jnp.dot(h_scratch[...], wt_ref[...],
                         preferred_element_type=jnp.float32)
                 + bt_ref[...])                                        # (S, T)
    m = jnp.max(tag_space, axis=-1, keepdims=True)
    lse = m + jnp.log(jnp.sum(jnp.exp(tag_space - m), axis=-1, keepdims=True))
    out_ref[...] = tag_space - lse


def prepare_params(params):
    """One-time prep: pre-transpose weights, pre-fold biases (no per-call glue)."""
    H = params["w_hh"].shape[0]
    T = params["w_tag"].shape[0]
    return {
        "embedding": jnp.asarray(params["embedding"], jnp.float32),        # (V, E)
        "w_ih_t": jnp.asarray(params["w_ih"].T, jnp.float32),              # (E, H)
        "w_hh_t": jnp.asarray(params["w_hh"].T, jnp.float32),              # (H, H)
        "b_rnn": jnp.asarray(params["b_ih"] + params["b_hh"],
                             jnp.float32).reshape(1, H),                   # (1, H)
        "w_tag_t": jnp.asarray(params["w_tag"].T, jnp.float32),            # (H, T)
        "b_tag": jnp.asarray(params["b_tag"], jnp.float32).reshape(1, T),  # (1, T)
    }


@jax.jit
def simple_rnn_forward(sentence, prepared):
    """sentence: (S,) int32 token ids. Returns (S, tagset) log-probs."""
    # Embedding lookup (glue).
    # TODO(synk): could fold the gather into the kernel via PrefetchScalarGridSpec
    # + pl.Element row-gather for long sequences; negligible at S=8.
    embeds = jnp.take(prepared["embedding"], sentence, axis=0)             # (S, E)

    S = embeds.shape[0]
    H = prepared["w_hh_t"].shape[0]
    T = prepared["w_tag_t"].shape[1]

    vmem = pl.BlockSpec(memory_space=pltpu.MemorySpace.VMEM)

    return pl.pallas_call(
        simple_rnn_kernel,
        out_shape=jax.ShapeDtypeStruct((S, T), jnp.float32),
        in_specs=[vmem] * 6,
        out_specs=vmem,
        scratch_shapes=[pltpu.VMEM((S, H), jnp.float32)],
    )(
        embeds,
        prepared["w_ih_t"],
        prepared["w_hh_t"],
        prepared["b_rnn"],
        prepared["w_tag_t"],
        prepared["b_tag"],
    )


def reference_forward(sentence, params):
    """Pure-JAX reference mirroring the PyTorch forward."""
    embeds = jnp.take(params["embedding"], sentence, axis=0).astype(jnp.float32)
    H = params["w_hh"].shape[0]

    def step(h, x_t):
        h_new = jnp.tanh(params["w_ih"] @ x_t + params["b_ih"]
                         + params["w_hh"] @ h + params["b_hh"])
        return h_new, h_new

    _, rnn_out = lax.scan(step, jnp.zeros((H,), jnp.float32), embeds)
    tag_space = rnn_out @ params["w_tag"].T + params["b_tag"]
    return jax.nn.log_softmax(tag_space, axis=1)


def init_params(key, vocab_size, embedding_dim, hidden_dim, tagset_size):
    ks = jax.random.split(key, 7)
    bound = 1.0 / np.sqrt(hidden_dim)
    return {
        "embedding": jax.random.normal(ks[0], (vocab_size, embedding_dim), jnp.float32),
        "w_ih": jax.random.uniform(ks[1], (hidden_dim, embedding_dim), jnp.float32, -bound, bound),
        "w_hh": jax.random.uniform(ks[2], (hidden_dim, hidden_dim), jnp.float32, -bound, bound),
        "b_ih": jax.random.uniform(ks[3], (hidden_dim,), jnp.float32, -bound, bound),
        "b_hh": jax.random.uniform(ks[4], (hidden_dim,), jnp.float32, -bound, bound),
        "w_tag": jax.random.uniform(ks[5], (tagset_size, hidden_dim), jnp.float32, -bound, bound),
        "b_tag": jax.random.uniform(ks[6], (tagset_size,), jnp.float32, -bound, bound),
    }


if __name__ == "__main__":
    vocab_size, embedding_dim, hidden_dim, tagset_size = 50, 16, 32, 8
    seq_len = 8

    key = jax.random.PRNGKey(0)
    pkey, skey = jax.random.split(key)
    params = init_params(pkey, vocab_size, embedding_dim, hidden_dim, tagset_size)
    sentence = jax.random.randint(skey, (seq_len,), 0, vocab_size, dtype=jnp.int32)

    prepared = prepare_params(params)   # one-time: transpose weights, fold biases

    out = jax.block_until_ready(simple_rnn_forward(sentence, prepared))
    ref = jax.block_until_ready(reference_forward(sentence, params))

    assert out.shape == (seq_len, tagset_size)
    np.testing.assert_allclose(np.asarray(out), np.asarray(ref), rtol=1e-5, atol=1e-5)
    print("KERNEL_OK")
</pallas_src>

<mosaic_0001>
module attributes {stable_mosaic.version = 11 : i64} {
  func.func @simple_rnn_kernel(%arg0: memref<8x16xf32, #tpu.memory_space<vmem>>, %arg1: memref<16x32xf32, #tpu.memory_space<vmem>>, %arg2: memref<32x32xf32, #tpu.memory_space<vmem>>, %arg3: memref<1x32xf32, #tpu.memory_space<vmem>>, %arg4: memref<32x8xf32, #tpu.memory_space<vmem>>, %arg5: memref<1x8xf32, #tpu.memory_space<vmem>>, %arg6: memref<8x8xf32, #tpu.memory_space<vmem>>, %arg7: memref<8x32xf32, #tpu.memory_space<vmem>>) attributes {dimension_semantics = [], scalar_prefetch = 0 : i64, scratch_operands = 1 : i64, tpu.core_type = #tpu.core_type<tc>} {
    %c0 = arith.constant 0 : index
    %c0_0 = arith.constant 0 : index
    %0 = vector.load %arg0[%c0, %c0_0] : memref<8x16xf32, #tpu.memory_space<vmem>>, vector<8x16xf32>
    %c0_1 = arith.constant 0 : index
    %c0_2 = arith.constant 0 : index
    %1 = vector.load %arg1[%c0_1, %c0_2] : memref<16x32xf32, #tpu.memory_space<vmem>>, vector<16x32xf32>
    %cst = arith.constant dense<0.000000e+00> : vector<8x32xf32>
    %2 = tpu.matmul %0, %1, %cst {dimension_numbers = #tpu.dot_dimension_numbers<[1], [0], [0], [1], [0, 0, 1, 1], [], []>} : vector<8x16xf32>, vector<16x32xf32>, vector<8x32xf32> -> vector<8x32xf32>
    %c0_3 = arith.constant 0 : index
    %c0_4 = arith.constant 0 : index
    %3 = vector.load %arg3[%c0_3, %c0_4] : memref<1x32xf32, #tpu.memory_space<vmem>>, vector<1x32xf32>
    %4 = vector.broadcast %3 : vector<1x32xf32> to vector<8x32xf32>
    %5 = arith.addf %2, %4 : vector<8x32xf32>
    %c0_5 = arith.constant 0 : index
    %c0_6 = arith.constant 0 : index
    %6 = vector.load %arg7[%c0_5, %c0_6] : memref<8x32xf32, #tpu.memory_space<vmem>>, vector<8x32xf32>
    tpu.vector_store %arg7[%c0_5, %c0_6], %5 {strides = array<i32>} : memref<8x32xf32, #tpu.memory_space<vmem>>, vector<8x32xf32>,
    %c0_7 = arith.constant 0 : index
    %c0_8 = arith.constant 0 : index
    %7 = vector.load %arg2[%c0_7, %c0_8] : memref<32x32xf32, #tpu.memory_space<vmem>>, vector<32x32xf32>
    %cst_9 = arith.constant 0.000000e+00 : f32
    %8 = vector.broadcast %cst_9 : f32 to vector<1x32xf32>
    %c0_i32 = arith.constant 0 : i32
    %9 = arith.index_cast %c0_i32 : i32 to index
    %c0_10 = arith.constant 0 : index
    %10 = vector.load %arg7[%9, %c0_10] : memref<8x32xf32, #tpu.memory_space<vmem>>, vector<1x32xf32>
    %cst_11 = arith.constant dense<0.000000e+00> : vector<1x32xf32>
    %11 = tpu.matmul %8, %7, %cst_11 {dimension_numbers = #tpu.dot_dimension_numbers<[1], [0], [0], [1], [0, 0, 1, 1], [], []>} : vector<1x32xf32>, vector<32x32xf32>, vector<1x32xf32> -> vector<1x32xf32>
    %12 = arith.addf %10, %11 : vector<1x32xf32>
    %13 = math.tanh %12 : vector<1x32xf32>
    %14 = arith.index_cast %c0_i32 : i32 to index
    %c0_12 = arith.constant 0 : index
    %15 = vector.load %arg7[%14, %c0_12] : memref<8x32xf32, #tpu.memory_space<vmem>>, vector<1x32xf32>
    tpu.vector_store %arg7[%14, %c0_12], %13 {strides = array<i32>} : memref<8x32xf32, #tpu.memory_space<vmem>>, vector<1x32xf32>,
    %c1_i32 = arith.constant 1 : i32
    %16 = arith.index_cast %c1_i32 : i32 to index
    %c0_13 = arith.constant 0 : index
    %17 = vector.load %arg7[%16, %c0_13] : memref<8x32xf32, #tpu.memory_space<vmem>>, vector<1x32xf32>
    %cst_14 = arith.constant dense<0.000000e+00> : vector<1x32xf32>
    %18 = tpu.matmul %13, %7, %cst_14 {dimension_numbers = #tpu.dot_dimension_numbers<[1], [0], [0], [1], [0, 0, 1, 1], [], []>} : vector<1x32xf32>, vector<32x32xf32>, vector<1x32xf32> -> vector<1x32xf32>
    %19 = arith.addf %17, %18 : vector<1x32xf32>
    %20 = math.tanh %19 : vector<1x32xf32>
    %21 = arith.index_cast %c1_i32 : i32 to index
    %c0_15 = arith.constant 0 : index
    %22 = vector.load %arg7[%21, %c0_15] : memref<8x32xf32, #tpu.memory_space<vmem>>, vector<1x32xf32>
    tpu.vector_store %arg7[%21, %c0_15], %20 {strides = array<i32>} : memref<8x32xf32, #tpu.memory_space<vmem>>, vector<1x32xf32>,
    %c2_i32 = arith.constant 2 : i32
    %23 = arith.index_cast %c2_i32 : i32 to index
    %c0_16 = arith.constant 0 : index
    %24 = vector.load %arg7[%23, %c0_16] : memref<8x32xf32, #tpu.memory_space<vmem>>, vector<1x32xf32>
    %cst_17 = arith.constant dense<0.000000e+00> : vector<1x32xf32>
    %25 = tpu.matmul %20, %7, %cst_17 {dimension_numbers = #tpu.dot_dimension_numbers<[1], [0], [0], [1], [0, 0, 1, 1], [], []>} : vector<1x32xf32>, vector<32x32xf32>, vector<1x32xf32> -> vector<1x32xf32>
    %26 = arith.addf %24, %25 : vector<1x32xf32>
    %27 = math.tanh %26 : vector<1x32xf32>
    %28 = arith.index_cast %c2_i32 : i32 to index
    %c0_18 = arith.constant 0 : index
    %29 = vector.load %arg7[%28, %c0_18] : memref<8x32xf32, #tpu.memory_space<vmem>>, vector<1x32xf32>
    tpu.vector_store %arg7[%28, %c0_18], %27 {strides = array<i32>} : memref<8x32xf32, #tpu.memory_space<vmem>>, vector<1x32xf32>,
    %c3_i32 = arith.constant 3 : i32
    %30 = arith.index_cast %c3_i32 : i32 to index
    %c0_19 = arith.constant 0 : index
    %31 = vector.load %arg7[%30, %c0_19] : memref<8x32xf32, #tpu.memory_space<vmem>>, vector<1x32xf32>
    %cst_20 = arith.constant dense<0.000000e+00> : vector<1x32xf32>
    %32 = tpu.matmul %27, %7, %cst_20 {dimension_numbers = #tpu.dot_dimension_numbers<[1], [0], [0], [1], [0, 0, 1, 1], [], []>} : vector<1x32xf32>, vector<32x32xf32>, vector<1x32xf32> -> vector<1x32xf32>
    %33 = arith.addf %31, %32 : vector<1x32xf32>
    %34 = math.tanh %33 : vector<1x32xf32>
    %35 = arith.index_cast %c3_i32 : i32 to index
    %c0_21 = arith.constant 0 : index
    %36 = vector.load %arg7[%35, %c0_21] : memref<8x32xf32, #tpu.memory_space<vmem>>, vector<1x32xf32>
    tpu.vector_store %arg7[%35, %c0_21], %34 {strides = array<i32>} : memref<8x32xf32, #tpu.memory_space<vmem>>, vector<1x32xf32>,
    %c4_i32 = arith.constant 4 : i32
    %37 = arith.index_cast %c4_i32 : i32 to index
    %c0_22 = arith.constant 0 : index
    %38 = vector.load %arg7[%37, %c0_22] : memref<8x32xf32, #tpu.memory_space<vmem>>, vector<1x32xf32>
    %cst_23 = arith.constant dense<0.000000e+00> : vector<1x32xf32>
    %39 = tpu.matmul %34, %7, %cst_23 {dimension_numbers = #tpu.dot_dimension_numbers<[1], [0], [0], [1], [0, 0, 1, 1], [], []>} : vector<1x32xf32>, vector<32x32xf32>, vector<1x32xf32> -> vector<1x32xf32>
    %40 = arith.addf %38, %39 : vector<1x32xf32>
    %41 = math.tanh %40 : vector<1x32xf32>
    %42 = arith.index_cast %c4_i32 : i32 to index
    %c0_24 = arith.constant 0 : index
    %43 = vector.load %arg7[%42, %c0_24] : memref<8x32xf32, #tpu.memory_space<vmem>>, vector<1x32xf32>
    tpu.vector_store %arg7[%42, %c0_24], %41 {strides = array<i32>} : memref<8x32xf32, #tpu.memory_space<vmem>>, vector<1x32xf32>,
    %c5_i32 = arith.constant 5 : i32
    %44 = arith.index_cast %c5_i32 : i32 to index
    %c0_25 = arith.constant 0 : index
    %45 = vector.load %arg7[%44, %c0_25] : memref<8x32xf32, #tpu.memory_space<vmem>>, vector<1x32xf32>
    %cst_26 = arith.constant dense<0.000000e+00> : vector<1x32xf32>
    %46 = tpu.matmul %41, %7, %cst_26 {dimension_numbers = #tpu.dot_dimension_numbers<[1], [0], [0], [1], [0, 0, 1, 1], [], []>} : vector<1x32xf32>, vector<32x32xf32>, vector<1x32xf32> -> vector<1x32xf32>
    %47 = arith.addf %45, %46 : vector<1x32xf32>
    %48 = math.tanh %47 : vector<1x32xf32>
    %49 = arith.index_cast %c5_i32 : i32 to index
    %c0_27 = arith.constant 0 : index
    %50 = vector.load %arg7[%49, %c0_27] : memref<8x32xf32, #tpu.memory_space<vmem>>, vector<1x32xf32>
    tpu.vector_store %arg7[%49, %c0_27], %48 {strides = array<i32>} : memref<8x32xf32, #tpu.memory_space<vmem>>, vector<1x32xf32>,
    %c6_i32 = arith.constant 6 : i32
    %51 = arith.index_cast %c6_i32 : i32 to index
    %c0_28 = arith.constant 0 : index
    %52 = vector.load %arg7[%51, %c0_28] : memref<8x32xf32, #tpu.memory_space<vmem>>, vector<1x32xf32>
    %cst_29 = arith.constant dense<0.000000e+00> : vector<1x32xf32>
    %53 = tpu.matmul %48, %7, %cst_29 {dimension_numbers = #tpu.dot_dimension_numbers<[1], [0], [0], [1], [0, 0, 1, 1], [], []>} : vector<1x32xf32>, vector<32x32xf32>, vector<1x32xf32> -> vector<1x32xf32>
    %54 = arith.addf %52, %53 : vector<1x32xf32>
    %55 = math.tanh %54 : vector<1x32xf32>
    %56 = arith.index_cast %c6_i32 : i32 to index
    %c0_30 = arith.constant 0 : index
    %57 = vector.load %arg7[%56, %c0_30] : memref<8x32xf32, #tpu.memory_space<vmem>>, vector<1x32xf32>
    tpu.vector_store %arg7[%56, %c0_30], %55 {strides = array<i32>} : memref<8x32xf32, #tpu.memory_space<vmem>>, vector<1x32xf32>,
    %c7_i32 = arith.constant 7 : i32
    %58 = arith.index_cast %c7_i32 : i32 to index
    %c0_31 = arith.constant 0 : index
    %59 = vector.load %arg7[%58, %c0_31] : memref<8x32xf32, #tpu.memory_space<vmem>>, vector<1x32xf32>
    %cst_32 = arith.constant dense<0.000000e+00> : vector<1x32xf32>
    %60 = tpu.matmul %55, %7, %cst_32 {dimension_numbers = #tpu.dot_dimension_numbers<[1], [0], [0], [1], [0, 0, 1, 1], [], []>} : vector<1x32xf32>, vector<32x32xf32>, vector<1x32xf32> -> vector<1x32xf32>
    %61 = arith.addf %59, %60 : vector<1x32xf32>
    %62 = math.tanh %61 : vector<1x32xf32>
    %63 = arith.index_cast %c7_i32 : i32 to index
    %c0_33 = arith.constant 0 : index
    %64 = vector.load %arg7[%63, %c0_33] : memref<8x32xf32, #tpu.memory_space<vmem>>, vector<1x32xf32>
    tpu.vector_store %arg7[%63, %c0_33], %62 {strides = array<i32>} : memref<8x32xf32, #tpu.memory_space<vmem>>, vector<1x32xf32>,
    %c8_i32 = arith.constant 8 : i32
    %c0_34 = arith.constant 0 : index
    %c0_35 = arith.constant 0 : index
    %65 = vector.load %arg7[%c0_34, %c0_35] : memref<8x32xf32, #tpu.memory_space<vmem>>, vector<8x32xf32>
    %c0_36 = arith.constant 0 : index
    %c0_37 = arith.constant 0 : index
    %66 = vector.load %arg4[%c0_36, %c0_37] : memref<32x8xf32, #tpu.memory_space<vmem>>, vector<32x8xf32>
    %cst_38 = arith.constant dense<0.000000e+00> : vector<8x8xf32>
    %67 = tpu.matmul %65, %66, %cst_38 {dimension_numbers = #tpu.dot_dimension_numbers<[1], [0], [0], [1], [0, 0, 1, 1], [], []>} : vector<8x32xf32>, vector<32x8xf32>, vector<8x8xf32> -> vector<8x8xf32>
    %c0_39 = arith.constant 0 : index
    %c0_40 = arith.constant 0 : index
    %68 = vector.load %arg5[%c0_39, %c0_40] : memref<1x8xf32, #tpu.memory_space<vmem>>, vector<1x8xf32>
    %69 = vector.broadcast %68 : vector<1x8xf32> to vector<8x8xf32>
    %70 = arith.addf %67, %69 : vector<8x8xf32>
    %cst_41 = arith.constant dense<0xFF800000> : vector<8xf32>
    %71 = vector.multi_reduction <maximumf>, %70, %cst_41 [1] : vector<8x8xf32> to vector<8xf32>
    %72 = vector.shape_cast %71 : vector<8xf32> to vector<8x1xf32>
    %73 = vector.broadcast %72 : vector<8x1xf32> to vector<8x8xf32>
    %74 = arith.subf %70, %73 : vector<8x8xf32>
    %75 = math.exp %74 : vector<8x8xf32>
    %cst_42 = arith.constant dense<0.000000e+00> : vector<8xf32>
    %76 = vector.multi_reduction <add>, %75, %cst_42 [1] : vector<8x8xf32> to vector<8xf32>
    %77 = vector.shape_cast %76 : vector<8xf32> to vector<8x1xf32>
    %78 = math.log %77 : vector<8x1xf32>
    %79 = arith.addf %72, %78 : vector<8x1xf32>
    %80 = vector.broadcast %79 : vector<8x1xf32> to vector<8x8xf32>
    %81 = arith.subf %70, %80 : vector<8x8xf32>
    %c0_43 = arith.constant 0 : index
    %c0_44 = arith.constant 0 : index
    %82 = vector.load %arg6[%c0_43, %c0_44] : memref<8x8xf32, #tpu.memory_space<vmem>>, vector<8x8xf32>
    tpu.vector_store %arg6[%c0_43, %c0_44], %81 {strides = array<i32>} : memref<8x8xf32, #tpu.memory_space<vmem>>, vector<8x8xf32>,
    return
  }
}

</mosaic_0001>

<bundles_post_ra>
// kernel: simple_rnn_forward.1
= control target key start
LH: loop header
LB: loop body
LE: loop exit
PB: predicated region body
PF: predicated region fallthrough
CT: control target
= control target key end

     0   :  { %v1055_v1 = vmov 0.0   ;;  %vm1056_vm0 = vmmov 0   ;;  %vm34_vm1 = vcmask 130048   ;;  %s1254_s0 = inlined_call_operand.vmem [shape: f32[8,16], index: 0, kind: input, shape index: {}]   ;;  %s1255_s1 = inlined_call_operand.vmem [shape: f32[16,32], index: 1, kind: input, shape index: {}]   ;;  %s1256_s2 = inlined_call_operand.vmem [shape: f32[32,32], index: 2, kind: input, shape index: {}]   ;;  %s1257_s3 = inlined_call_operand.vmem [shape: f32[1,32], index: 3, kind: input, shape index: {}]   ;;  %s1258_s4 = inlined_call_operand.vmem [shape: f32[32,8], index: 4, kind: input, shape index: {}]   ;;  %s1259_s5 = inlined_call_operand.vmem [shape: f32[1,8], index: 5, kind: input, shape index: {}]   ;;  %s1260_s6 = inlined_call_operand.hbm [shape: f32[8,8], index: 6, kind: output, shape index: {}]  }
   0x1   :  { %v26_v0 = vld [vmem:[%s1255_s1 + $0x8] sm:$0xff]  ;;  %904 = vmatprep.subr.mxu0 %v1055_v1  ;;  %v25_v2 = vld [vmem:[%s1255_s1] sm:$0xff]  ;;  %908 = vmatprep.mubr.msk.f32.mxu0 %vm1056_vm0, %v1055_v1  ;;  %v1105_v3 = vld [vmem:[%s1256_s2 + $0x18] sm:$0xff] }
   0x2   :  { %905 = vmatpush3.msra.mxu0 %v26_v0  ;;  %v24_v4 = vld [vmem:[%s1254_s0] sm:$0xff]  ;;  %911 = vmatprep.subr.mxu1 %v1055_v1  ;;  %v1114_v5 = vld [vmem:[%s1256_s2 + $0x10] sm:$0xff] }
   0x3   :  { %11 = vsyncpa [#allocation4], 0  ;;  %906 = vmatprep.subr.mxu0 %v1055_v1  ;;  %912 = vmatpush3.msra.mxu1 %v1105_v3  ;;  %v1122_v6 = vld [vmem:[%s1256_s2 + $0x8] sm:$0xff]  ;;  %v1129_v7 = vld [vmem:[%s1256_s2] sm:$0xff]  ;;  %vm108_vm2 = vcmask 261120   ;;  %vm190_vm3 = vcmask 253952  }
   0x4   :  { %907 = vmatpush3.msra.mxu0 %v25_v2  ;;  %913 = vmatprep.subr.mxu1 %v1055_v1  ;;  %v845_v8 = vld [vmem:[%s1257_s3] ss:$0 sm:$0xff]  ;;  %v735_v47 = vld [vmem:[%s1258_s4 + $0x18] sm:$0xff]  ;;  %v734_v48 = vld [vmem:[%s1258_s4 + $0x10] sm:$0xff]  ;;  %vm816_vm4 = vcmask 64512  }
   0x5   :  { %909 = vmatmul.mubr.msk.f32.vlgmr.msra.gmra.mxu0 %vm34_vm1, %v24_v4  ;;  %914 = vmatpush3.msra.mxu1 %v1114_v5  ;;  %v733_v49 = vld [vmem:[%s1258_s4 + $0x8] sm:$0xff]  ;;  %v732_v50 = vld [vmem:[%s1258_s4] sm:$0xff]  ;;  %s1057_s4 = smov [#allocation3]  }
   0x6   :  { %915 = vmatprep.subr.mxu1 %v1055_v1  ;;  %919 = vmatprep.mubr.msk.f32.mxu1 %vm1056_vm0, %v1055_v1  ;;  %v854_v57 = vld [vmem:[%s1259_s5] ss:$0 sm:$0xff]  ;;  %s837_s5 = sshll.u32 %s1057_s4, 4  ;;  %s838_s5 = int_to_ptr.vmem [resolvable:$true] %s837_s5 }
   0x7   :  { %916 = vmatpush3.msra.mxu1 %v1122_v6  ;;  %922 = vmatprep.subr.mxu0 %v1055_v1  ;;  %s1033_s19 = scalar_lea.vmem %s838_s5, 128  ;;  %p1038_p1 = scmp.lt.s32.totalorder %s838_s5, %s838_s5 }
   0x8   :  { %917 = vmatprep.subr.mxu1 %v1055_v1  ;;  %923 = vmatpush3.msra.mxu0 %v1105_v3  ;;  %p1034_p0 = scmp.ne.s32.totalorder %s838_s5, %s1033_s19  ;;  %p1039_p2 = scmp.lt.s32.totalorder %s1033_s19, %s1033_s19 }
   0x9   :  { %918 = vmatpush3.msra.mxu1 %v1129_v7  ;;  %924 = vmatprep.subr.mxu0 %v1055_v1 }
   0xa   :  { %920 = vmatmul.mubr.f32.vlgmr.msra.gmra.mxu1 %v1055_v1  ;;  %925 = vmatpush3.msra.mxu0 %v1114_v5  ;;  %p1040_p3 = por %p1039_p2, %p1038_p1 }
   0xb   :  { %926 = vmatprep.subr.mxu0 %v1055_v1  ;;  %930 = vmatprep.mubr.msk.f32.mxu0 %vm1056_vm0, %v1055_v1 }
   0xc   :  { %927 = vmatpush3.msra.mxu0 %v1122_v6  ;;  %933 = vmatprep.subr.mxu1 %v1055_v1  ;;  %p1041_p4 = pnand %p1040_p3, %p1034_p0 }
   0xd   :  { %928 = vmatprep.subr.mxu0 %v1055_v1  ;;  %934 = vmatpush3.msra.mxu1 %v1105_v3 }
   0xe   :  { %929 = vmatpush3.msra.mxu0 %v1129_v7  ;;  %935 = vmatprep.subr.mxu1 %v1055_v1 }
   0xf   :  { %936 = vmatpush3.msra.mxu1 %v1114_v5  ;;  %941 = vmatprep.mubr.msk.f32.mxu1 %vm1056_vm0, %v1055_v1 }
  0x10   :  { %937 = vmatprep.subr.mxu1 %v1055_v1  ;;  %944 = vmatprep.subr.mxu0 %v1055_v1 }
  0x11   :  { %938 = vmatpush3.msra.mxu1 %v1122_v6 }
  0x12   :  { %939 = vmatprep.subr.mxu1 %v1055_v1 }
  0x13   :  { %940 = vmatpush3.msra.mxu1 %v1129_v7 }
  0x14   :  { %955 = vmatprep.subr.mxu1 %v1055_v1 }
  0xc5   :  { %v104_v9 = vpop.f32.mrf.mxu0 }
  0xc6   :  { %v105_v10 = vadd.f32 %v845_v8, %v104_v9 }
  0xc7   :  { %v910_v11 = vpop.f32.mrf.mxu0 }
  0xc8   :  { %109 = vst.msk [vmem:[#allocation2] sm:$0xff] %vm108_vm2, %v105_v10 }
  0xca   :  { %v184_v12 = vpop.f32.mrf.mxu1 }
  0xcc   :  { %v921_v13 = vpop.f32.mrf.mxu1 }
  0xcf   :  { %v114_v14 = vld [vmem:[#allocation2] sm:$0x1]  ;;  %v192_v17 = vld [vmem:[#allocation2 + $0x1] sm:$0x1]  ;;  %v269_v22 = vld [vmem:[#allocation2 + $0x2] sm:$0x1] }
  0xd0   :  { %v188_v15 = vadd.f32 %v184_v12, %v114_v14  ;;  %v346_v27 = vld [vmem:[#allocation2 + $0x3] sm:$0x1]  ;;  %v423_v32 = vld [vmem:[#allocation2 + $0x4] sm:$0x1]  ;;  %v500_v37 = vld [vmem:[#allocation2 + $0x5] sm:$0x1] }
  0xd1   :  { %v577_v42 = vld [vmem:[#allocation2 + $0x6] sm:$0x1]  ;;  %v654_v51 = vld [vmem:[#allocation2 + $0x7] sm:$0x1] }
  0xd2   :  { %1013 = vtanh.f32 %v188_v15 }
  0xdf   :  { %v1014_v16 = vpop.eup %1013 }
  0xe0   :  { %191 = vst.msk [vmem:[#allocation2] sm:$0x1] %vm190_vm3, %v1014_v16  ;;  %931 = vmatmul.mubr.msk.f32.vlgmr.msra.gmra.mxu0 %vm108_vm2, %v1014_v16 }
  0xe1   :  { %945 = vmatpush3.msra.mxu0 %v1105_v3  ;;  %952 = vmatprep.mubr.msk.f32.mxu0 %vm1056_vm0, %v1055_v1 }
  0xe2   :  { %946 = vmatprep.subr.mxu0 %v1055_v1 }
  0xe3   :  { %947 = vmatpush3.msra.mxu0 %v1114_v5 }
  0xe4   :  { %948 = vmatprep.subr.mxu0 %v1055_v1 }
  0xe5   :  { %949 = vmatpush3.msra.mxu0 %v1122_v6 }
  0xe6   :  { %950 = vmatprep.subr.mxu0 %v1055_v1 }
  0xe7   :  { %951 = vmatpush3.msra.mxu0 %v1129_v7 }
  0xe8   :  { %966 = vmatprep.subr.mxu0 %v1055_v1 }
 0x1a0   :  { %v262_v18 = vpop.f32.mrf.mxu0 }
 0x1a1   :  { %v266_v19 = vadd.f32 %v262_v18, %v192_v17 }
 0x1a2   :  { %v932_v20 = vpop.f32.mrf.mxu0 }
 0x1a3   :  { %1015 = vtanh.f32 %v266_v19 }
 0x1b0   :  { %v1016_v21 = vpop.eup %1015 }
 0x1b1   :  { %268 = vst.msk [vmem:[#allocation2 + $0x1] sm:$0x1] %vm190_vm3, %v1016_v21  ;;  %942 = vmatmul.mubr.msk.f32.vlgmr.msra.gmra.mxu1 %vm108_vm2, %v1016_v21 }
 0x1b2   :  { %956 = vmatpush3.msra.mxu1 %v1105_v3  ;;  %963 = vmatprep.mubr.msk.f32.mxu1 %vm1056_vm0, %v1055_v1 }
 0x1b3   :  { %957 = vmatprep.subr.mxu1 %v1055_v1 }
 0x1b4   :  { %958 = vmatpush3.msra.mxu1 %v1114_v5 }
 0x1b5   :  { %959 = vmatprep.subr.mxu1 %v1055_v1 }
 0x1b6   :  { %960 = vmatpush3.msra.mxu1 %v1122_v6 }
 0x1b7   :  { %961 = vmatprep.subr.mxu1 %v1055_v1 }
 0x1b8   :  { %962 = vmatpush3.msra.mxu1 %v1129_v7 }
 0x1b9   :  { %977 = vmatprep.subr.mxu1 %v1055_v1 }
 0x271   :  { %v339_v23 = vpop.f32.mrf.mxu1 }
 0x272   :  { %v343_v24 = vadd.f32 %v339_v23, %v269_v22 }
 0x273   :  { %v943_v25 = vpop.f32.mrf.mxu1 }
 0x274   :  { %1017 = vtanh.f32 %v343_v24 }
 0x281   :  { %v1018_v26 = vpop.eup %1017 }
 0x282   :  { %345 = vst.msk [vmem:[#allocation2 + $0x2] sm:$0x1] %vm190_vm3, %v1018_v26  ;;  %953 = vmatmul.mubr.msk.f32.vlgmr.msra.gmra.mxu0 %vm108_vm2, %v1018_v26 }
 0x283   :  { %967 = vmatpush3.msra.mxu0 %v1105_v3  ;;  %974 = vmatprep.mubr.msk.f32.mxu0 %vm1056_vm0, %v1055_v1 }
 0x284   :  { %968 = vmatprep.subr.mxu0 %v1055_v1 }
 0x285   :  { %969 = vmatpush3.msra.mxu0 %v1114_v5 }
 0x286   :  { %970 = vmatprep.subr.mxu0 %v1055_v1 }
 0x287   :  { %971 = vmatpush3.msra.mxu0 %v1122_v6 }
 0x288   :  { %972 = vmatprep.subr.mxu0 %v1055_v1 }
 0x289   :  { %973 = vmatpush3.msra.mxu0 %v1129_v7 }
 0x28a   :  { %988 = vmatprep.subr.mxu0 %v1055_v1 }
 0x342   :  { %v416_v28 = vpop.f32.mrf.mxu0 }
 0x343   :  { %v420_v29 = vadd.f32 %v416_v28, %v346_v27 }
 0x344   :  { %v954_v30 = vpop.f32.mrf.mxu0 }
 0x345   :  { %1019 = vtanh.f32 %v420_v29 }
 0x352   :  { %v1020_v31 = vpop.eup %1019 }
 0x353   :  { %422 = vst.msk [vmem:[#allocation2 + $0x3] sm:$0x1] %vm190_vm3, %v1020_v31  ;;  %964 = vmatmul.mubr.msk.f32.vlgmr.msra.gmra.mxu1 %vm108_vm2, %v1020_v31 }
 0x354   :  { %978 = vmatpush3.msra.mxu1 %v1105_v3  ;;  %985 = vmatprep.mubr.msk.f32.mxu1 %vm1056_vm0, %v1055_v1 }
 0x355   :  { %979 = vmatprep.subr.mxu1 %v1055_v1 }
 0x356   :  { %980 = vmatpush3.msra.mxu1 %v1114_v5 }
 0x357   :  { %981 = vmatprep.subr.mxu1 %v1055_v1 }
 0x358   :  { %982 = vmatpush3.msra.mxu1 %v1122_v6 }
 0x359   :  { %983 = vmatprep.subr.mxu1 %v1055_v1 }
 0x35a   :  { %984 = vmatpush3.msra.mxu1 %v1129_v7 }
 0x35b   :  { %999 = vmatprep.subr.mxu1 %v1055_v1 }
 0x413   :  { %v493_v33 = vpop.f32.mrf.mxu1 }
 0x414   :  { %v497_v34 = vadd.f32 %v493_v33, %v423_v32 }
 0x415   :  { %v965_v35 = vpop.f32.mrf.mxu1 }
 0x416   :  { %1021 = vtanh.f32 %v497_v34 }
 0x423   :  { %v1022_v36 = vpop.eup %1021 }
 0x424   :  { %499 = vst.msk [vmem:[#allocation2 + $0x4] sm:$0x1] %vm190_vm3, %v1022_v36  ;;  %975 = vmatmul.mubr.msk.f32.vlgmr.msra.gmra.mxu0 %vm108_vm2, %v1022_v36 }
 0x425   :  { %989 = vmatpush3.msra.mxu0 %v1105_v3  ;;  %996 = vmatprep.mubr.msk.f32.mxu0 %vm1056_vm0, %v1055_v1 }
 0x426   :  { %990 = vmatprep.subr.mxu0 %v1055_v1 }
 0x427   :  { %991 = vmatpush3.msra.mxu0 %v1114_v5 }
 0x428   :  { %992 = vmatprep.subr.mxu0 %v1055_v1 }
 0x429   :  { %993 = vmatpush3.msra.mxu0 %v1122_v6 }
 0x42a   :  { %994 = vmatprep.subr.mxu0 %v1055_v1 }
 0x42b   :  { %995 = vmatpush3.msra.mxu0 %v1129_v7 }
 0x4e4   :  { %v570_v38 = vpop.f32.mrf.mxu0 }
 0x4e5   :  { %v574_v39 = vadd.f32 %v570_v38, %v500_v37 }
 0x4e6   :  { %v976_v40 = vpop.f32.mrf.mxu0 }
 0x4e7   :  { %1023 = vtanh.f32 %v574_v39 }
 0x4f4   :  { %v1024_v41 = vpop.eup %1023 }
 0x4f5   :  { %576 = vst.msk [vmem:[#allocation2 + $0x5] sm:$0x1] %vm190_vm3, %v1024_v41  ;;  %986 = vmatmul.mubr.msk.f32.vlgmr.msra.gmra.mxu1 %vm108_vm2, %v1024_v41 }
 0x4f6   :  { %1007 = vmatprep.mubr.msk.f32.mxu1 %vm1056_vm0, %v1055_v1  ;;  %1000 = vmatpush3.msra.mxu1 %v735_v47 }
 0x4f7   :  { %1001 = vmatprep.subr.mxu1 %v1055_v1 }
 0x4f8   :  { %1002 = vmatpush3.msra.mxu1 %v734_v48 }
 0x4f9   :  { %1003 = vmatprep.subr.mxu1 %v1055_v1 }
 0x4fa   :  { %1004 = vmatpush3.msra.mxu1 %v733_v49 }
 0x4fb   :  { %1005 = vmatprep.subr.mxu1 %v1055_v1 }
 0x4fc   :  { %1006 = vmatpush3.msra.mxu1 %v732_v50 }
 0x5b5   :  { %v647_v43 = vpop.f32.mrf.mxu1 }
 0x5b6   :  { %v651_v44 = vadd.f32 %v647_v43, %v577_v42 }
 0x5b7   :  { %v987_v45 = vpop.f32.mrf.mxu1 }
 0x5b8   :  { %1025 = vtanh.f32 %v651_v44 }
 0x5c5   :  { %v1026_v46 = vpop.eup %1025 }
 0x5c6   :  { %653 = vst.msk [vmem:[#allocation2 + $0x6] sm:$0x1] %vm190_vm3, %v1026_v46  ;;  %997 = vmatmul.mubr.msk.f32.vlgmr.msra.gmra.mxu0 %vm108_vm2, %v1026_v46 }
 0x686   :  { %v724_v52 = vpop.f32.mrf.mxu0 }
 0x687   :  { %v728_v53 = vadd.f32 %v724_v52, %v654_v51 }
 0x688   :  { %v998_v54 = vpop.f32.mrf.mxu0 }
 0x689   :  { %1027 = vtanh.f32 %v728_v53 }
 0x696   :  { %v1028_v55 = vpop.eup %1027 }
 0x697   :  { %730 = vst.msk [vmem:[#allocation2 + $0x7] sm:$0x1] %vm190_vm3, %v1028_v55 }
 0x69e   :  { %v731_v56 = vld [vmem:[#allocation2] sm:$0xff] }
 0x69f   :  { %1008 = vmatmul.mubr.msk.f32.vlgmr.msra.gmra.mxu1 %vm108_vm2, %v731_v56 }
 0x75f   :  { %v812_v58 = vpop.f32.mrf.mxu1 }
 0x760   :  { %v813_v59 = vadd.f32 %v854_v57, %v812_v58 }
 0x761   :  { %v1009_v60 = vpop.f32.mrf.mxu1 }
 0x762   :  { %v817_v61 = vsel %vm816_vm4, %v813_v59, -inf }
 0x763   :  { %818 = vmax.xlane.f32.xlu0 %v817_v61 }
 0x7ec   :  { %v819_v62 = vpop.xlane.xlu0 %818 }
 0x7ed   :  { %v820_v63 = vsub.f32 %v813_v59, %v819_v62 }
 0x7ef   :  { %v821_v0 = vmul.f32 1.442695, %v820_v63 }
 0x7f1   :  { %1029 = vpow2.f32 %v821_v0 }
 0x7fe   :  { %v1030_v1 = vpop.eup %1029 }
 0x7ff   :  { %v823_v2 = vsel %vm816_vm4, %v1030_v1, 0.0 }
 0x800   :  { %824 = vadd.xlane.f32.xlu0 %v823_v2 }
 0x889   :  { %v825_v3 = vpop.xlane.xlu0 %824 }
 0x88a   :  { %1031 = vlog2.f32 %v825_v3 }
 0x897   :  { %v1032_v4 = vpop.eup %1031 }
 0x898   :  { %v827_v5 = vmul.f32 0.6931472, %v1032_v4 }
 0x89a   :  { %v828_v6 = vadd.f32 %v827_v5, %v819_v62 }
 0x89c   :  { %v829_v7 = vsub.f32 %v813_v59, %v828_v6 }
 0x89e   :  { %830 = vst.msk [vmem:[#allocation3] sm:$0xff] %vm816_vm4, %v829_v7 }
 0x89f   :  { %1044 = shalt.err (!%p1041_p4)
}
 0x8a0   :  { %840 = dma.vmem_to_hbm [thread:$0]  %s838_s5, 128, %s1260_s6, [#allocation4]  }
 0x8a1   :  { %1053 = dma.done.wait [#allocation4], 128  }
 0x8a2   :  { %1054 = vsyncadd [#allocation4], 4294967168 }
 0x8a3   :  { %844 = vsyncpa [#allocation4], 1 }

</bundles_post_ra>
